<compile_context>
chip_gen: v6e
topology: v6e:2x2x1
jax: 0.10.0
libtpu: 0.0.40
codegen_flags: <defaults>
</compile_context>

<pallas_src>
import jax
import jax.numpy as jnp
from jax.experimental import pallas as pl
from jax.experimental.pallas import tpu as pltpu


# ---------------------------------------------------------------------------
# Kernels
# ---------------------------------------------------------------------------

def _conv1x1_kernel(x_ref, w_ref, b_ref, o_ref):
    # x_ref: (C_in, tile_T)   w_ref: (emb_dim, C_in)   b_ref: (emb_dim, 1)
    # o_ref: (emb_dim, tile_T)
    y = jnp.dot(
        w_ref[...], x_ref[...],
        preferred_element_type=jnp.float32,
        precision=jax.lax.Precision.HIGHEST,
    )
    o_ref[...] = (y + b_ref[...]).astype(o_ref.dtype)


def _conv1x1_small_kernel(x_ref, w_ref, b_ref, o_ref):
    # Whole-problem kernel (single pallas_call step, everything resident in VMEM).
    # x_ref: (B, C_in, T)   w_ref: (emb_dim, C_in)   b_ref: (emb_dim, 1)
    # o_ref: (B, emb_dim, T)
    w = w_ref[...]
    b = b_ref[...]

    def body(i, carry):
        y = jnp.dot(
            w, x_ref[i],
            preferred_element_type=jnp.float32,
            precision=jax.lax.Precision.HIGHEST,
        )
        o_ref[i] = (y + b).astype(o_ref.dtype)
        return carry

    jax.lax.fori_loop(0, x_ref.shape[0], body, 0)


# ---------------------------------------------------------------------------
# Tiling helpers
# ---------------------------------------------------------------------------

def _vmem_capacity_bytes():
    """Physical VMEM on the current chip; conservative fallback if unknown."""
    try:
        info = pltpu.get_tpu_info()
        cap = getattr(info, "vmem_capacity_bytes", None)
        if cap:
            return int(cap)
    except Exception:
        pass
    return 64 << 20  # v7x-sized fallback (v5e/v6e have 128 MiB -> still safe)


def _choose_tile_t(T, C_in, emb_dim, itemsize, budget_bytes, B, max_tile_t):
    """Pick the T tile: biggest tile (<= max_tile_t columns) whose double-buffered
    input+output footprint fits the VMEM budget; full T for small inputs.
    For B == 1 and large T, force >= 2 tiles so both v7x TensorCores get work."""
    bytes_per_col = 2 * (C_in + emb_dim) * max(itemsize, 1)  # 2 bufs x (in + out)
    max_cols = max(128, (budget_bytes // bytes_per_col) // 128 * 128)
    tile_t = min(max_tile_t, max_cols)
    if T <= tile_t:
        tile_t = T  # full-extent block (exempt from the 128-divisibility rule)
        if B == 1 and T >= 1024:
            # Split T into (at least) two tiles so the second TensorCore on v7x
            # has work on the "parallel" grid axis.
            tile_t = min(T, ((pl.cdiv(T, 2) + 127) // 128) * 128)
    return tile_t


# ---------------------------------------------------------------------------
# Forward wrapper
# ---------------------------------------------------------------------------

def codebook_embedding_forward(latents, weight, bias, *,
                               max_tile_t=16384,
                               small_path_bytes=2 << 20):
    """latents: (B, C_in, T) (NCW, like the PyTorch Conv1d input).
    weight:  (emb_dim, C_in, 1) Conv1d weight.
    bias:    (emb_dim,).
    Returns: (B, emb_dim, T), same dtype as latents (accumulation in f32)."""
    B, C_in, T = latents.shape
    emb_dim = weight.shape[0]

    w_ec = weight[:, :, 0]                 # (emb_dim, C_in)
    b_2d = bias.reshape(emb_dim, 1)        # broadcast over the T lanes

    itemsize = jnp.dtype(latents.dtype).itemsize

    # ---- small-problem fast path: single step, no grid, no per-step overhead ----
    total_bytes = B * T * (C_in + emb_dim) * itemsize
    if total_bytes <= small_path_bytes:
        return pl.pallas_call(
            _conv1x1_small_kernel,
            out_shape=jax.ShapeDtypeStruct((B, emb_dim, T), latents.dtype),
        )(latents, w_ec, b_2d)

    # ---- streaming path: (B, T-tiles) grid, double-buffered by BlockSpec ----
    cap = _vmem_capacity_bytes()
    budget = max(8 << 20, (cap * 3) // 8)   # ~48 MiB on v5e/v6e, ~24 MiB on v7x
    tile_t = _choose_tile_t(T, C_in, emb_dim, itemsize, budget, B, max_tile_t)

    # Size the scoped VMEM limit from what we actually use (double-buffered
    # in+out tiles, resident weight/bias, plus headroom), clamped to physical.
    tile_bytes = 2 * (C_in + emb_dim) * tile_t * itemsize
    fixed_bytes = (emb_dim * C_in + emb_dim) * 4
    vmem_limit = int(min(int(cap * 0.85), tile_bytes + fixed_bytes + (4 << 20)))
    vmem_limit = max(vmem_limit, 16 << 20)

    grid = (B, pl.cdiv(T, tile_t))

    return pl.pallas_call(
        _conv1x1_kernel,
        out_shape=jax.ShapeDtypeStruct((B, emb_dim, T), latents.dtype),
        grid_spec=pltpu.PrefetchScalarGridSpec(
            num_scalar_prefetch=0,
            grid=grid,
            in_specs=[
                # batch dim squeezed out of the block -> kernel sees (C_in, tile_T)
                pl.BlockSpec((None, C_in, tile_t), lambda b, t: (b, 0, t)),
                # weight / bias: constant block index across the grid (resident)
                pl.BlockSpec((emb_dim, C_in), lambda b, t: (0, 0)),
                pl.BlockSpec((emb_dim, 1), lambda b, t: (0, 0)),
            ],
            out_specs=pl.BlockSpec((None, emb_dim, tile_t), lambda b, t: (b, 0, t)),
        ),
        compiler_params=pltpu.CompilerParams(
            dimension_semantics=("parallel", "parallel"),
            vmem_limit_bytes=vmem_limit,
        ),
    )(latents, w_ec, b_2d)


def _reference(latents, weight, bias):
    return jnp.einsum(
        "ec,bct->bet", weight[:, :, 0], latents,
        precision=jax.lax.Precision.HIGHEST,
    ) + bias[None, :, None]


# TODO(synk): from_codes() (embedding lookup against codec codebooks + special
# tokens) is not part of forward() and is not implemented here.

if __name__ == "__main__":
    # Module config (small): vocab_size / special tokens are irrelevant to forward();
    # forward() only uses out_proj = Conv1d(n_codebooks*latent_dim, emb_dim, 1).
    n_codebooks = 4
    latent_dim = 8
    emb_dim = 32
    C_in = n_codebooks * latent_dim

    key = jax.random.PRNGKey(0)
    k_x, k_w, k_b, k_x2, k_x3 = jax.random.split(key, 5)

    # Deterministic synthetic Conv1d params (shapes match nn.Conv1d(C_in, emb_dim, 1)).
    weight = jax.random.normal(k_w, (emb_dim, C_in, 1), dtype=jnp.float32) * 0.05
    bias = jax.random.normal(k_b, (emb_dim,), dtype=jnp.float32) * 0.05

    # --- 1) tiny problem: exercises the small-problem (single-step) fast path ---
    B, T = 2, 16
    latents = jax.random.normal(k_x, (B, C_in, T), dtype=jnp.float32)
    out = jax.block_until_ready(codebook_embedding_forward(latents, weight, bias))
    ref = _reference(latents, weight, bias)
    assert out.shape == (B, emb_dim, T)
    assert jnp.allclose(out, ref, atol=1e-5, rtol=1e-5)

    # --- 2) tiled path with a partial last T tile (T not a multiple of tile_t) ---
    B2, T2 = 2, 300
    latents2 = jax.random.normal(k_x2, (B2, C_in, T2), dtype=jnp.float32)
    out2 = jax.block_until_ready(
        codebook_embedding_forward(latents2, weight, bias,
                                   max_tile_t=128, small_path_bytes=0))
    ref2 = _reference(latents2, weight, bias)
    assert out2.shape == (B2, emb_dim, T2)
    assert jnp.allclose(out2, ref2, atol=1e-5, rtol=1e-5)

    # --- 3) B == 1, larger T: exercises the forced >=2-tile split (v7x parallelism) ---
    B3, T3 = 1, 2048
    latents3 = jax.random.normal(k_x3, (B3, C_in, T3), dtype=jnp.float32)
    out3 = jax.block_until_ready(
        codebook_embedding_forward(latents3, weight, bias, small_path_bytes=0))
    ref3 = _reference(latents3, weight, bias)
    assert out3.shape == (B3, emb_dim, T3)
    assert jnp.allclose(out3, ref3, atol=1e-5, rtol=1e-5)

    print("KERNEL_OK")
</pallas_src>

<mosaic_0001>
module attributes {stable_mosaic.version = 11 : i64} {
  func.func @_conv1x1_small_kernel(%arg0: memref<2x32x16xf32, #tpu.memory_space<vmem>>, %arg1: memref<32x32xf32, #tpu.memory_space<vmem>>, %arg2: memref<32x1xf32, #tpu.memory_space<vmem>>, %arg3: memref<2x32x16xf32, #tpu.memory_space<vmem>>) attributes {dimension_semantics = [], scalar_prefetch = 0 : i64, scratch_operands = 0 : i64, tpu.core_type = #tpu.core_type<tc>} {
    %c0 = arith.constant 0 : index
    %c0_0 = arith.constant 0 : index
    %0 = vector.load %arg1[%c0, %c0_0] : memref<32x32xf32, #tpu.memory_space<vmem>>, vector<32x32xf32>
    %c0_1 = arith.constant 0 : index
    %c0_2 = arith.constant 0 : index
    %1 = vector.load %arg2[%c0_1, %c0_2] : memref<32x1xf32, #tpu.memory_space<vmem>>, vector<32x1xf32>
    %c0_i32 = arith.constant 0 : i32
    %c2_i32 = arith.constant 2 : i32
    %2 = arith.addi %c0_i32, %c2_i32 : i32
    %c1_i32 = arith.constant 1 : i32
    scf.for %arg4 = %c0_i32 to %2 step %c1_i32  : i32 {
      %3 = arith.index_cast %arg4 : i32 to index
      %c0_4 = arith.constant 0 : index
      %c0_5 = arith.constant 0 : index
      %4 = vector.load %arg0[%3, %c0_4, %c0_5] : memref<2x32x16xf32, #tpu.memory_space<vmem>>, vector<1x32x16xf32>
      %5 = vector.shape_cast %4 : vector<1x32x16xf32> to vector<32x16xf32>
      %cst = arith.constant dense<0.000000e+00> : vector<32x16xf32>
      %6 = tpu.matmul %0, %5, %cst {dimension_numbers = #tpu.dot_dimension_numbers<[1], [0], [0], [1], [0, 0, 1, 1], [], []>, precision = #tpu.contract_precision<fp32>} : vector<32x32xf32>, vector<32x16xf32>, vector<32x16xf32> -> vector<32x16xf32>
      %7 = vector.broadcast %1 : vector<32x1xf32> to vector<32x16xf32>
      %8 = arith.addf %6, %7 : vector<32x16xf32>
      %9 = arith.index_cast %arg4 : i32 to index
      %c0_6 = arith.constant 0 : index
      %c0_7 = arith.constant 0 : index
      %10 = vector.load %arg3[%9, %c0_6, %c0_7] : memref<2x32x16xf32, #tpu.memory_space<vmem>>, vector<1x32x16xf32>
      %11 = vector.shape_cast %10 : vector<1x32x16xf32> to vector<32x16xf32>
      %12 = vector.shape_cast %8 : vector<32x16xf32> to vector<1x32x16xf32>
      tpu.vector_store %arg3[%9, %c0_6, %c0_7], %12 {strides = array<i32>} : memref<2x32x16xf32, #tpu.memory_space<vmem>>, vector<1x32x16xf32>,
    }
    %c2_i32_3 = arith.constant 2 : i32
    return
  }
}

</mosaic_0001>

<bundles_post_ra>
// kernel: tpu_custom_call.1
= control target key start
LH: loop header
LB: loop body
LE: loop exit
PB: predicated region body
PF: predicated region fallthrough
CT: control target
= control target key end

     0   :  { %s1040_s0 = inlined_call_operand.vmem [shape: f32[2,32,16], index: 0, kind: input, shape index: {}]   ;;  %s1041_s1 = inlined_call_operand.vmem [shape: f32[32,32], index: 1, kind: input, shape index: {}]   ;;  %s1042_s2 = inlined_call_operand.vmem [shape: f32[32,1], index: 2, kind: input, shape index: {}]   ;;  %s1043_s3 = inlined_call_operand.vmem [shape: f32[2,32,16], index: 3, kind: output, shape index: {}]  }
   0x1   :  { %v876_v0 = vld [vmem:[%s1041_s1] sm:$0xff]  ;;  %v881_v1 = vld [vmem:[%s1041_s1 + $0x8] sm:$0xff]  ;;  %v886_v2 = vld [vmem:[%s1041_s1 + $0x10] sm:$0xff] }
   0x2   :  { %v891_v3 = vld [vmem:[%s1041_s1 + $0x18] sm:$0xff]  ;;  %v896_v4 = vld [vmem:[%s1042_s2] sm:$0xff]  ;;  %v901_v5 = vld [vmem:[%s1042_s2 + $0x8] sm:$0xff]  ;;  %s913_s1 = smov 0  }
   0x3   :  { %v906_v6 = vld [vmem:[%s1042_s2 + $0x10] sm:$0xff]  ;;  %v911_v7 = vld [vmem:[%s1042_s2 + $0x18] sm:$0xff] }
   0x4 LB: > { %vm54_vm0 = vcmask 261120   ;;  %v852_v12 = vmov 0   ;;  %s700_s2 = sshll.u32 %s850_s1, 5  ;;  %vm682_vm1 = vcmask 130048   ;;  %s27_s1 = sadd.s32 1, %s850_s1   ;;  %s850_s1 = sphi %s913_s1, %s27_s1  }
   0x5   : > { %v56_v8 = vsel %vm54_vm0, %v876_v0, 0  ;;  %v59_v9 = vsel %vm54_vm0, %v881_v1, 0  ;;  %v62_v10 = vsel %vm54_vm0, %v886_v2, 0  ;;  %v65_v11 = vsel %vm54_vm0, %v891_v3, 0  ;;  %842 = vset.pattern.permute.xlu0 %v852_v12  ;;  %843 = vset.pattern.permute.xlu1 %v852_v12  ;;  %s29_s30 = scalar_lea.vmem %s1040_s0, %s700_s2  ;;  %s681_s6 = scalar_lea.vmem %s1043_s3, %s700_s2 }
   0x6   : > { %v923_v13 = vand.u32 4294901760, %v56_v8  ;;  %v925_v14 = vand.u32 4294901760, %v59_v9  ;;  %v927_v15 = vand.u32 4294901760, %v62_v10  ;;  %v929_v16 = vand.u32 4294901760, %v65_v11  ;;  %36 = vperm.xlu0 %842, %v896_v4   ;;  %46 = vperm.xlu1 %843, %v906_v6   ;;  %v33_v17 = vld [vmem:[%s29_s30 + $0x18] sm:$0xff]  ;;  %v32_v18 = vld [vmem:[%s29_s30 + $0x10] sm:$0xff] }
   0x7   : > { %v31_v19 = vld [vmem:[%s29_s30 + $0x8] sm:$0xff]  ;;  %v948_v23 = vand.u32 4294901760, %v33_v17  ;;  %v950_v24 = vand.u32 4294901760, %v32_v18  ;;  %v30_v26 = vld [vmem:[%s29_s30] sm:$0xff]  ;;  %p24_p0 = scmp.ge.s32.totalorder %s27_s1, 2  }
   0x8   : > { %v939_v20 = vsub.f32 %v56_v8, %v923_v13  ;;  %v942_v21 = vsub.f32 %v59_v9, %v925_v14  ;;  %v945_v22 = vsub.f32 %v62_v10, %v927_v15  ;;  %771 = vmatprep.mubr.f32.mxu1 %v923_v13  ;;  %v952_v25 = vand.u32 4294901760, %v31_v19 }
   0x9   : > { %v955_v27 = vsub.f32 %v65_v11, %v929_v16  ;;  %v957_v28 = vand.u32 4294901760, %v30_v26  ;;  %749 = vmatprep.subr.mxu0 %v948_v23  ;;  %v202_v32 = vsub.f32 %v33_v17, %v948_v23  ;;  %v209_v33 = vsub.f32 %v32_v18, %v950_v24 }
   0xa   : > { %v138_v29 = vand.u32 4294901760, %v939_v20  ;;  %v148_v30 = vand.u32 4294901760, %v942_v21  ;;  %v158_v31 = vand.u32 4294901760, %v945_v22  ;;  %41 = vperm.xlu0 %842, %v901_v5   ;;  %51 = vperm.xlu1 %843, %v911_v7   ;;  %v216_v34 = vsub.f32 %v31_v19, %v952_v25 }
   0xb   : > { %750 = vmatpush3.msra.mxu0 %v948_v23  ;;  %v223_v37 = vsub.f32 %v30_v26, %v957_v28  ;;  %v203_v38 = vand.u32 4294901760, %v202_v32  ;;  %v210_v39 = vand.u32 4294901760, %v209_v33  ;;  %v168_v41 = vand.u32 4294901760, %v955_v27 }
   0xc   : > { %v139_v35 = vsub.f32 %v939_v20, %v138_v29  ;;  %v149_v36 = vsub.f32 %v942_v21, %v148_v30  ;;  %751 = vmatprep.subr.mxu0 %v950_v24  ;;  %v217_v40 = vand.u32 4294901760, %v216_v34  ;;  %v159_v43 = vsub.f32 %v945_v22, %v158_v31 }
   0xd   : > { %752 = vmatpush3.msra.mxu0 %v950_v24  ;;  %v224_v44 = vand.u32 4294901760, %v223_v37  ;;  %v204_v45 = vsub.f32 %v202_v32, %v203_v38  ;;  %v211_v47 = vsub.f32 %v209_v33, %v210_v39  ;;  %v169_v51 = vsub.f32 %v955_v27, %v168_v41 }
   0xe   : > { %v140_v42 = vand.u32 4294901760, %v139_v35  ;;  %753 = vmatprep.subr.mxu0 %v952_v25  ;;  %v150_v46 = vand.u32 4294901760, %v149_v36  ;;  %v218_v48 = vsub.f32 %v216_v34, %v217_v40  ;;  %v160_v54 = vand.u32 4294901760, %v159_v43 }
   0xf   : > { %754 = vmatpush3.msra.mxu0 %v952_v25  ;;  %v205_v49 = vand.u32 4294901760, %v204_v45  ;;  %v212_v50 = vand.u32 4294901760, %v211_v47  ;;  %v225_v52 = vsub.f32 %v223_v37, %v224_v44  ;;  %v170_v55 = vand.u32 4294901760, %v169_v51 }
  0x10   : > { %757 = vmatprep.mubr.f32.mxu0 %v140_v42  ;;  %755 = vmatprep.subr.mxu0 %v957_v28  ;;  %v219_v53 = vand.u32 4294901760, %v218_v48 }
  0x11   : > { %756 = vmatpush3.msra.mxu0 %v957_v28  ;;  %763 = vmatprep.subr.mxu1 %v205_v49  ;;  %v226_v56 = vand.u32 4294901760, %v225_v52 }
  0x12   : > { %758 = vmatmul.mubr.f32.vlgmr.msra.gmra.mxu0 %v150_v46  ;;  %764 = vmatpush3.msra.mxu1 %v205_v49 }
  0x13   : > { %777 = vmatprep.subr.mxu0 %v202_v32  ;;  %765 = vmatprep.subr.mxu1 %v212_v50 }
  0x14   : > { %778 = vmatpush3.msra.mxu0 %v202_v32  ;;  %766 = vmatpush3.msra.mxu1 %v212_v50 }
  0x15   : > { %779 = vmatprep.subr.mxu0 %v209_v33  ;;  %767 = vmatprep.subr.mxu1 %v219_v53 }
  0x16   : > { %760 = vmatprep.mubr.f32.mxu0 %v160_v54  ;;  %768 = vmatpush3.msra.mxu1 %v219_v53 }
  0x17   : > { %780 = vmatpush3.msra.mxu0 %v209_v33  ;;  %769 = vmatprep.subr.mxu1 %v226_v56 }
  0x18   : > { %761 = vmatmul.mubr.f32.gmra.mxu0 %v170_v55  ;;  %781 = vmatprep.subr.mxu0 %v216_v34 }
  0x19   : > { %770 = vmatpush3.msra.mxu1 %v226_v56  ;;  %782 = vmatpush3.msra.mxu0 %v216_v34 }
  0x1a   : > { %772 = vmatmul.mubr.f32.vlgmr.msra.gmra.mxu1 %v925_v14  ;;  %783 = vmatprep.subr.mxu0 %v223_v37 }
  0x1b   : > { %791 = vmatprep.subr.mxu1 %v948_v23  ;;  %784 = vmatpush3.msra.mxu0 %v223_v37 }
  0x1c   : > { %785 = vmatprep.mubr.f32.mxu0 %v939_v20  ;;  %792 = vmatpush3.msra.mxu1 %v948_v23 }
  0x1d   : > { %786 = vmatmul.mubr.f32.vlgmr.msra.gmra.mxu0 %v942_v21  ;;  %793 = vmatprep.subr.mxu1 %v950_v24 }
  0x1e   : > { %805 = vmatprep.subr.mxu0 %v203_v38  ;;  %774 = vmatprep.mubr.f32.mxu1 %v927_v15 }
  0x1f   : > { %794 = vmatpush3.msra.mxu1 %v950_v24  ;;  %806 = vmatpush3.msra.mxu0 %v203_v38 }
  0x20   : > { %775 = vmatmul.mubr.f32.gmra.mxu1 %v929_v16  ;;  %795 = vmatprep.subr.mxu1 %v952_v25 }
  0x21   : > { %807 = vmatprep.subr.mxu0 %v210_v39  ;;  %788 = vmatprep.mubr.f32.mxu0 %v945_v22 }
  0x22   : > { %796 = vmatpush3.msra.mxu1 %v952_v25  ;;  %808 = vmatpush3.msra.mxu0 %v210_v39 }
  0x23   : > { %797 = vmatprep.subr.mxu1 %v957_v28  ;;  %789 = vmatmul.mubr.f32.gmra.mxu0 %v955_v27 }
  0x24   : > { %809 = vmatprep.subr.mxu0 %v217_v40  ;;  %798 = vmatpush3.msra.mxu1 %v957_v28 }
  0x25   : > { %799 = vmatprep.mubr.f32.mxu1 %v138_v29  ;;  %810 = vmatpush3.msra.mxu0 %v217_v40 }
  0x26   : > { %800 = vmatmul.mubr.f32.vlgmr.msra.gmra.mxu1 %v148_v30  ;;  %811 = vmatprep.subr.mxu0 %v224_v44 }
  0x27   : > { %819 = vmatprep.subr.mxu1 %v948_v23  ;;  %812 = vmatpush3.msra.mxu0 %v224_v44 }
  0x28   : > { %813 = vmatprep.mubr.f32.mxu0 %v923_v13  ;;  %820 = vmatpush3.msra.mxu1 %v948_v23 }
  0x29   : > { %814 = vmatmul.mubr.f32.vlgmr.msra.gmra.mxu0 %v925_v14  ;;  %821 = vmatprep.subr.mxu1 %v950_v24 }
  0x2a   : > { %802 = vmatprep.mubr.f32.mxu1 %v158_v31  ;;  %822 = vmatpush3.msra.mxu1 %v950_v24 }
  0x2b   : > { %816 = vmatprep.mubr.f32.mxu0 %v927_v15  ;;  %803 = vmatmul.mubr.f32.gmra.mxu1 %v168_v41 }
  0x2c   : > { %823 = vmatprep.subr.mxu1 %v952_v25  ;;  %827 = vmatprep.mubr.f32.mxu1 %v923_v13 }
  0x2d   : > { %824 = vmatpush3.msra.mxu1 %v952_v25  ;;  %817 = vmatmul.mubr.f32.gmra.mxu0 %v929_v16 }
  0x2e   : > { %825 = vmatprep.subr.mxu1 %v957_v28 }
  0x2f   : > { %826 = vmatpush3.msra.mxu1 %v957_v28 }
  0x30   : > { %828 = vmatmul.mubr.f32.vlgmr.msra.gmra.mxu1 %v925_v14 }
  0x31   : > { %830 = vmatprep.mubr.f32.mxu1 %v927_v15 }
  0x34   : > { %831 = vmatmul.mubr.f32.gmra.mxu1 %v929_v16 }
  0x81   : > { %v37_v59 = vpop.permute.xlu0 %36  ;;  %v47_v63 = vpop.permute.xlu1 %46 }
  0x85   : > { %v42_v10 = vpop.permute.xlu0 %41  ;;  %v52_v17 = vpop.permute.xlu1 %51 }
  0xd2   : > { %v759_v57 = vpop.f32.mrf.mxu0 }
  0xd3   : > { %v153_v13 = vadd.f32 %v759_v57, %v42_v10 }
  0xd4   : > { %v142_v58 = vpop.f32.mrf.mxu0 }
  0xd5   : > { %v143_v19 = vadd.f32 %v142_v58, %v37_v59 }
  0xd8   : > { %v762_v60 = vpop.f32.mrf.mxu0 }
  0xd9   : > { %v173_v20 = vadd.f32 %v762_v60, %v52_v17 }
  0xda   : > { %v162_v61 = vpop.f32.mrf.mxu0  ;;  %v773_v62 = vpop.f32.mrf.mxu1 }
  0xdb   : > { %v270_v15 = vadd.f32 %v773_v62, %v153_v13  ;;  %v163_v24 = vadd.f32 %v162_v61, %v47_v63 }
  0xdc   : > { %v263_v8 = vpop.f32.mrf.mxu1 }
  0xdd   : > { %v787_v9 = vpop.f32.mrf.mxu0  ;;  %v264_v22 = vadd.f32 %v263_v8, %v143_v19 }
  0xde   : > { %v369_v25 = vadd.f32 %v787_v9, %v270_v15 }
  0xdf   : > { %v361_v12 = vpop.f32.mrf.mxu0 }
  0xe0   : > { %v776_v11 = vpop.f32.mrf.mxu1  ;;  %v362_v28 = vadd.f32 %v361_v12, %v264_v22 }
  0xe1   : > { %v282_v26 = vadd.f32 %v776_v11, %v173_v20 }
  0xe2   : > { %v275_v18 = vpop.f32.mrf.mxu1 }
  0xe3   : > { %v790_v14 = vpop.f32.mrf.mxu0  ;;  %v276_v29 = vadd.f32 %v275_v18, %v163_v24 }
  0xe4   : > { %v383_v33 = vadd.f32 %v790_v14, %v282_v26 }
  0xe5   : > { %v375_v16 = vpop.f32.mrf.mxu0 }
  0xe6   : > { %v801_v21 = vpop.f32.mrf.mxu1  ;;  %v376_v37 = vadd.f32 %v375_v16, %v276_v29 }
  0xe7   : > { %v468_v30 = vadd.f32 %v801_v21, %v369_v25 }
  0xe8   : > { %v459_v23 = vpop.f32.mrf.mxu1 }
  0xe9   : > { %v815_v27 = vpop.f32.mrf.mxu0  ;;  %v460_v34 = vadd.f32 %v459_v23, %v362_v28 }
  0xea   : > { %v573_v38 = vadd.f32 %v815_v27, %v468_v30 }
  0xeb   : > { %v566_v31 = vpop.f32.mrf.mxu0  ;;  %v804_v32 = vpop.f32.mrf.mxu1 }
  0xec   : > { %v484_v39 = vadd.f32 %v804_v32, %v383_v33  ;;  %v567_v41 = vadd.f32 %v566_v31, %v460_v34 }
  0xed   : > { %v475_v35 = vpop.f32.mrf.mxu1  ;;  %v818_v36 = vpop.f32.mrf.mxu0 }
  0xee   : > { %v476_v42 = vadd.f32 %v475_v35, %v376_v37  ;;  %v585_v46 = vadd.f32 %v818_v36, %v484_v39 }
  0xef   : > { %v578_v44 = vpop.f32.mrf.mxu0 }
  0xf0   : > { %v829_v40 = vpop.f32.mrf.mxu1  ;;  %v579_v49 = vadd.f32 %v578_v44, %v476_v42 }
  0xf1   : > { %v666_v43 = vadd.f32 %v829_v40, %v573_v38 }
  0xf2   : > { %v659_v45 = vpop.f32.mrf.mxu1 }
  0xf3   : > { %684 = vst.msk [vmem:[%s681_s6 + $0x8] sm:$0xff] %vm682_vm1, %v666_v43  ;;  %v660_v47 = vadd.f32 %v659_v45, %v567_v41 }
  0xf4   : > { %v832_v48 = vpop.f32.mrf.mxu1 }
  0xf5   : > { %683 = vst.msk [vmem:[%s681_s6] sm:$0xff] %vm682_vm1, %v660_v47  ;;  %v678_v50 = vadd.f32 %v832_v48, %v585_v46  ;;  %26 = sbr.rel (!%p24_p0) target bundleno = 4 (0x4), region = 41 }
  0xf6   : > { %v671_v51 = vpop.f32.mrf.mxu1 }
  0xf7   : > { %686 = vst.msk [vmem:[%s681_s6 + $0x18] sm:$0xff] %vm682_vm1, %v678_v50  ;;  %v672_v52 = vadd.f32 %v671_v51, %v579_v49 }
  0xf9   : > { %685 = vst.msk [vmem:[%s681_s6 + $0x10] sm:$0xff] %vm682_vm1, %v672_v52 }

</bundles_post_ra>
